<compile_context>
chip_gen: v7x
topology: tpu7x:2x2x1
jax: 0.10.0
libtpu: 0.0.40
codegen_flags: <defaults>
</compile_context>

<pallas_src>
import functools

import jax
import jax.numpy as jnp
from jax import lax
from jax.experimental import pallas as pl
from jax.experimental.pallas import tpu as pltpu


def _lstm_recurrence_kernel(u_ref, h0_ref, c0_ref, wih_ref, whh_ref, b_ref,
                            states_ref, gx_sc, h_sc, c_sc):
    """One grid step == one chunk of t_blk timesteps of the LSTM recurrence.

    u_ref:       (t_blk*Bp, nu)       raw inputs for this chunk (time-major,
                                      rows = t*Bp + b)
    h0_ref/c0_ref: (Bp, nx)           initial state (read only at chunk 0)
    wih_ref:     (nu, 4*nx)           input weight, pre-transposed
    whh_ref:     (nx, 4*nx)           recurrent weight, pre-transposed
    b_ref:       (1, 4*nx)            combined bias b_ih + b_hh
    states_ref:  (t_blk//4, Bp, 4*nx) hidden states, 4 timesteps packed in lanes
    gx_sc:       (t_blk*Bp, 4*nx) f32 fused input projection scratch
    h_sc/c_sc:   (Bp, nx) f32         recurrent carry across grid steps
    """
    tb = pl.program_id(0)

    @pl.when(tb == 0)
    def _():
        h_sc[...] = h0_ref[...].astype(jnp.float32)
        c_sc[...] = c0_ref[...].astype(jnp.float32)

    nx = h_sc.shape[-1]
    bp = h_sc.shape[0]
    n_quads = states_ref.shape[0]

    # Fused input projection for the whole chunk: one big lane-dense MXU matmul
    # + bias add, off the serial critical path (amortized over t_blk steps).
    gx_sc[...] = (jnp.dot(u_ref[...], wih_ref[...],
                          preferred_element_type=jnp.float32)
                  + b_ref[...])

    whh = whh_ref[...]  # hoist the (nx, 4*nx) weight load out of the time loop

    def quad_step(q, carry):
        h, c = carry
        hs = []
        for j in range(4):  # static: 4 timesteps per lane-dense store
            t = q * 4 + j
            row = pl.multiple_of(t * bp, bp)
            gates = gx_sc[pl.ds(row, bp), :] + jnp.dot(
                h, whh, preferred_element_type=jnp.float32)
            # Full-vreg EUP pushes, then cheap lane-slice extraction of strips.
            sg = jax.nn.sigmoid(gates)
            th = jnp.tanh(gates)
            i_ = sg[:, 0 * nx:1 * nx]
            f_ = sg[:, 1 * nx:2 * nx]
            o_ = sg[:, 3 * nx:4 * nx]
            g_ = th[:, 2 * nx:3 * nx]
            c = f_ * c + i_ * g_
            h = o_ * jnp.tanh(c)
            hs.append(h)
        # Lane-dense (Bp, 4*nx=128) packed store: 4 timesteps per vst.
        states_ref[q] = jnp.concatenate(hs, axis=-1).astype(states_ref.dtype)
        return (h, c)

    # Partial unroll (2 quads = 8 timesteps) keeps code size bounded while
    # giving the LLO scheduler visibility; carry stays in vregs across the
    # chunk and is written back to VMEM scratch once.
    h_fin, c_fin = lax.fori_loop(0, n_quads, quad_step,
                                 (h_sc[...], c_sc[...]), unroll=2)
    h_sc[...] = h_fin
    c_sc[...] = c_fin


def _pad_to(x, size, axis):
    pad = size - x.shape[axis]
    if pad == 0:
        return x
    widths = [(0, 0)] * x.ndim
    widths[axis] = (0, pad)
    return jnp.pad(x, widths)


@functools.partial(jax.jit, static_argnames=("t_blk",))
def lstm_forward(u, h0, c0, w_ih, w_hh, b_ih, b_hh, w_out, b_out, *, t_blk=128):
    """
    u:     (B, T, nu)   batch-first, like the PyTorch module
    h0,c0: (1, B, nx)
    w_ih:  (4*nx, nu),  w_hh: (4*nx, nx),  b_ih/b_hh: (4*nx,)
    w_out: (ny, nx),    b_out: (ny,)
    Returns (y, states): y (B, T, ny), states (B, T, nx).
    """
    B, T, nu = u.shape
    nx = w_hh.shape[1]

    # ---- host-side restructuring (parallel work, fused/pipelined by XLA) ----
    t_blk = max(4, (int(t_blk) // 4) * 4)        # multiple of 4 (lane packing)
    t_blk = min(t_blk, ((T + 3) // 4) * 4)       # don't over-pad short sequences
    Tp = pl.cdiv(T, t_blk) * t_blk               # pad T to a multiple of t_blk
    Bp = ((B + 7) // 8) * 8                      # pad B to 8 sublanes
    n_chunks = Tp // t_blk

    u_tm = jnp.transpose(u, (1, 0, 2))                       # (T, B, nu)
    u_tm = _pad_to(_pad_to(u_tm, Tp, 0), Bp, 1)              # (Tp, Bp, nu)
    # (n_chunks, t_blk*Bp, nu): row t*Bp + b within a chunk == (time t, batch b)
    u_chunks = u_tm.reshape(n_chunks, t_blk * Bp, nu).astype(jnp.float32)
    h0_p = _pad_to(h0[0], Bp, 0)                             # (Bp, nx)
    c0_p = _pad_to(c0[0], Bp, 0)                             # (Bp, nx)

    wih_t = w_ih.T.astype(jnp.float32)                       # (nu, 4*nx)
    whh_t = w_hh.T.astype(jnp.float32)                       # (nx, 4*nx)
    bias2d = (b_ih + b_hh).astype(jnp.float32).reshape(1, 4 * nx)

    grid_spec = pltpu.PrefetchScalarGridSpec(
        num_scalar_prefetch=0,
        grid=(n_chunks,),
        in_specs=[
            pl.BlockSpec((None, t_blk * Bp, nu), lambda tb: (tb, 0, 0)),  # u chunk
            pl.BlockSpec((Bp, nx), lambda tb: (0, 0)),                    # h0
            pl.BlockSpec((Bp, nx), lambda tb: (0, 0)),                    # c0
            pl.BlockSpec((nu, 4 * nx), lambda tb: (0, 0)),                # W_ih^T
            pl.BlockSpec((nx, 4 * nx), lambda tb: (0, 0)),                # W_hh^T
            pl.BlockSpec((1, 4 * nx), lambda tb: (0, 0)),                 # bias
        ],
        # Lane-dense output: 4 timesteps packed along lanes (last dim = 4*nx = 128).
        out_specs=pl.BlockSpec((t_blk // 4, Bp, 4 * nx), lambda tb: (tb, 0, 0)),
        scratch_shapes=[
            pltpu.VMEM((t_blk * Bp, 4 * nx), jnp.float32),  # fused gx chunk
            pltpu.VMEM((Bp, nx), jnp.float32),              # h carry
            pltpu.VMEM((Bp, nx), jnp.float32),              # c carry
        ],
    )

    states_packed = pl.pallas_call(
        _lstm_recurrence_kernel,
        out_shape=jax.ShapeDtypeStruct((Tp // 4, Bp, 4 * nx), u.dtype),
        grid_spec=grid_spec,
        compiler_params=pltpu.CompilerParams(
            dimension_semantics=("arbitrary",),   # serial recurrence carry in scratch
        ),
    )(u_chunks, h0_p, c0_p, wih_t, whh_t, bias2d)

    # Unpack the lane-packed timesteps (pure layout plumbing), drop padding,
    # back to batch-first.
    states_tm = (states_packed.reshape(Tp // 4, Bp, 4, nx)
                 .transpose(0, 2, 1, 3)
                 .reshape(Tp, Bp, nx))
    states = jnp.transpose(states_tm[:T, :B], (1, 0, 2))     # (B, T, nx)

    # Hoisted output head: one batched matmul (ny is tiny / lane-sparse);
    # HIGHEST precision for strict f32 parity with the reference.
    y = jnp.einsum("btx,yx->bty", states, w_out,
                   precision=jax.lax.Precision.HIGHEST) + b_out
    return y, states


def _lstm_forward_ref(u, h0, c0, w_ih, w_hh, b_ih, b_hh, w_out, b_out):
    """Pure-JAX reference (lax.scan) mirroring torch.nn.LSTM semantics."""
    nx = w_hh.shape[1]

    def step(carry, x_t):
        h, c = carry
        gates = x_t @ w_ih.T + b_ih + h @ w_hh.T + b_hh
        i = jax.nn.sigmoid(gates[:, 0 * nx:1 * nx])
        f = jax.nn.sigmoid(gates[:, 1 * nx:2 * nx])
        g = jnp.tanh(gates[:, 2 * nx:3 * nx])
        o = jax.nn.sigmoid(gates[:, 3 * nx:4 * nx])
        c_new = f * c + i * g
        h_new = o * jnp.tanh(c_new)
        return (h_new, c_new), h_new

    u_tm = jnp.transpose(u, (1, 0, 2))
    _, hs = jax.lax.scan(step, (h0[0], c0[0]), u_tm)
    states = jnp.transpose(hs, (1, 0, 2))
    y = states @ w_out.T + b_out
    return y, states


if __name__ == "__main__":
    # Small shapes consistent with the module's forward.
    B, T, NU, NX, NY = 2, 8, 4, 32, 3

    key = jax.random.PRNGKey(0)
    ks = jax.random.split(key, 9)
    bound = 1.0 / jnp.sqrt(NX)

    u = jax.random.normal(ks[0], (B, T, NU), dtype=jnp.float32)
    # learn_init_hidden=True -> h0/c0 ~ U[0,1), shape (1, batches, nx)
    h0 = jax.random.uniform(ks[1], (1, B, NX), dtype=jnp.float32)
    c0 = jax.random.uniform(ks[2], (1, B, NX), dtype=jnp.float32)
    # torch.nn.LSTM / Linear default init: U(-1/sqrt(nx), 1/sqrt(nx))
    w_ih = jax.random.uniform(ks[3], (4 * NX, NU), minval=-bound, maxval=bound, dtype=jnp.float32)
    w_hh = jax.random.uniform(ks[4], (4 * NX, NX), minval=-bound, maxval=bound, dtype=jnp.float32)
    b_ih = jax.random.uniform(ks[5], (4 * NX,), minval=-bound, maxval=bound, dtype=jnp.float32)
    b_hh = jax.random.uniform(ks[6], (4 * NX,), minval=-bound, maxval=bound, dtype=jnp.float32)
    w_out = jax.random.uniform(ks[7], (NY, NX), minval=-bound, maxval=bound, dtype=jnp.float32)
    b_out = jax.random.uniform(ks[8], (NY,), minval=-bound, maxval=bound, dtype=jnp.float32)

    y, states = lstm_forward(u, h0, c0, w_ih, w_hh, b_ih, b_hh, w_out, b_out)
    jax.block_until_ready((y, states))

    y_ref, states_ref = _lstm_forward_ref(u, h0, c0, w_ih, w_hh, b_ih, b_hh, w_out, b_out)
    assert y.shape == (B, T, NY) and states.shape == (B, T, NX)
    assert jnp.allclose(y, y_ref, atol=1e-5, rtol=1e-5)
    assert jnp.allclose(states, states_ref, atol=1e-5, rtol=1e-5)

    print("KERNEL_OK")
</pallas_src>

<mosaic_0001>
module attributes {stable_mosaic.version = 11 : i64} {
  func.func @_lstm_recurrence_kernel(%arg0: i32, %arg1: memref<1x64x4xf32, #tpu.memory_space<vmem>>, %arg2: memref<8x32xf32, #tpu.memory_space<vmem>>, %arg3: memref<8x32xf32, #tpu.memory_space<vmem>>, %arg4: memref<4x128xf32, #tpu.memory_space<vmem>>, %arg5: memref<32x128xf32, #tpu.memory_space<vmem>>, %arg6: memref<1x128xf32, #tpu.memory_space<vmem>>, %arg7: memref<2x8x128xf32, #tpu.memory_space<vmem>>, %arg8: memref<64x128xf32, #tpu.memory_space<vmem>>, %arg9: memref<8x32xf32, #tpu.memory_space<vmem>>, %arg10: memref<8x32xf32, #tpu.memory_space<vmem>>) attributes {dimension_semantics = [#tpu.dimension_semantics<arbitrary>], iteration_bounds = array<i64: 1>, scalar_prefetch = 0 : i64, scratch_operands = 3 : i64, tpu.core_type = #tpu.core_type<tc>, window_params = [{transform_indices = @transform_0, window_bounds = array<i64: 1, 64, 4>}, {pipeline_mode = #tpu.pipeline_mode<synchronous>, transform_indices = @transform_1, window_bounds = array<i64: 8, 32>}, {pipeline_mode = #tpu.pipeline_mode<synchronous>, transform_indices = @transform_2, window_bounds = array<i64: 8, 32>}, {pipeline_mode = #tpu.pipeline_mode<synchronous>, transform_indices = @transform_3, window_bounds = array<i64: 4, 128>}, {pipeline_mode = #tpu.pipeline_mode<synchronous>, transform_indices = @transform_4, window_bounds = array<i64: 32, 128>}, {pipeline_mode = #tpu.pipeline_mode<synchronous>, transform_indices = @transform_5, window_bounds = array<i64: 1, 128>}, {transform_indices = @transform_6, window_bounds = array<i64: 2, 8, 128>}]} {
    %c0_i32 = arith.constant 0 : i32
    %0 = arith.cmpi eq, %arg0, %c0_i32 : i32
    %1 = arith.extui %0 : i1 to i32
    %c0_i32_0 = arith.constant 0 : i32
    %2 = arith.cmpi ne, %1, %c0_i32_0 : i32
    scf.if %2 {
      %c0_69 = arith.constant 0 : index
      %c0_70 = arith.constant 0 : index
      %210 = vector.load %arg2[%c0_69, %c0_70] : memref<8x32xf32, #tpu.memory_space<vmem>>, vector<8x32xf32>
      %c0_71 = arith.constant 0 : index
      %c0_72 = arith.constant 0 : index
      %211 = vector.load %arg9[%c0_71, %c0_72] : memref<8x32xf32, #tpu.memory_space<vmem>>, vector<8x32xf32>
      tpu.vector_store %arg9[%c0_71, %c0_72], %210 {strides = array<i32>} : memref<8x32xf32, #tpu.memory_space<vmem>>, vector<8x32xf32>,
      %c0_73 = arith.constant 0 : index
      %c0_74 = arith.constant 0 : index
      %212 = vector.load %arg3[%c0_73, %c0_74] : memref<8x32xf32, #tpu.memory_space<vmem>>, vector<8x32xf32>
      %c0_75 = arith.constant 0 : index
      %c0_76 = arith.constant 0 : index
      %213 = vector.load %arg10[%c0_75, %c0_76] : memref<8x32xf32, #tpu.memory_space<vmem>>, vector<8x32xf32>
      tpu.vector_store %arg10[%c0_75, %c0_76], %212 {strides = array<i32>} : memref<8x32xf32, #tpu.memory_space<vmem>>, vector<8x32xf32>,
    } else {
    }
    %c0 = arith.constant 0 : index
    %c0_1 = arith.constant 0 : index
    %c0_2 = arith.constant 0 : index
    %3 = vector.load %arg1[%c0, %c0_1, %c0_2] : memref<1x64x4xf32, #tpu.memory_space<vmem>>, vector<1x64x4xf32>
    %4 = vector.shape_cast %3 : vector<1x64x4xf32> to vector<64x4xf32>
    %c0_3 = arith.constant 0 : index
    %c0_4 = arith.constant 0 : index
    %5 = vector.load %arg4[%c0_3, %c0_4] : memref<4x128xf32, #tpu.memory_space<vmem>>, vector<4x128xf32>
    %cst = arith.constant dense<0.000000e+00> : vector<64x128xf32>
    %6 = tpu.matmul %4, %5, %cst {dimension_numbers = #tpu.dot_dimension_numbers<[1], [0], [0], [1], [0, 0, 1, 1], [], []>} : vector<64x4xf32>, vector<4x128xf32>, vector<64x128xf32> -> vector<64x128xf32>
    %c0_5 = arith.constant 0 : index
    %c0_6 = arith.constant 0 : index
    %7 = vector.load %arg6[%c0_5, %c0_6] : memref<1x128xf32, #tpu.memory_space<vmem>>, vector<1x128xf32>
    %8 = vector.broadcast %7 : vector<1x128xf32> to vector<64x128xf32>
    %9 = arith.addf %6, %8 : vector<64x128xf32>
    %c0_7 = arith.constant 0 : index
    %c0_8 = arith.constant 0 : index
    %10 = vector.load %arg8[%c0_7, %c0_8] : memref<64x128xf32, #tpu.memory_space<vmem>>, vector<64x128xf32>
    tpu.vector_store %arg8[%c0_7, %c0_8], %9 {strides = array<i32>} : memref<64x128xf32, #tpu.memory_space<vmem>>, vector<64x128xf32>,
    %c0_9 = arith.constant 0 : index
    %c0_10 = arith.constant 0 : index
    %11 = vector.load %arg5[%c0_9, %c0_10] : memref<32x128xf32, #tpu.memory_space<vmem>>, vector<32x128xf32>
    %c0_11 = arith.constant 0 : index
    %c0_12 = arith.constant 0 : index
    %12 = vector.load %arg9[%c0_11, %c0_12] : memref<8x32xf32, #tpu.memory_space<vmem>>, vector<8x32xf32>
    %c0_13 = arith.constant 0 : index
    %c0_14 = arith.constant 0 : index
    %13 = vector.load %arg10[%c0_13, %c0_14] : memref<8x32xf32, #tpu.memory_space<vmem>>, vector<8x32xf32>
    %c0_i32_15 = arith.constant 0 : i32
    %c4_i32 = arith.constant 4 : i32
    %14 = arith.muli %c0_i32_15, %c4_i32 : i32
    %c0_i32_16 = arith.constant 0 : i32
    %15 = arith.addi %14, %c0_i32_16 : i32
    %c8_i32 = arith.constant 8 : i32
    %16 = arith.muli %15, %c8_i32 : i32
    %17 = tpu.assume_multiple %16, 8 : i32
    %18 = arith.index_cast %17 : i32 to index
    %c0_17 = arith.constant 0 : index
    %19 = vector.load %arg8[%18, %c0_17] : memref<64x128xf32, #tpu.memory_space<vmem>>, vector<8x128xf32>
    %cst_18 = arith.constant dense<0.000000e+00> : vector<8x128xf32>
    %20 = tpu.matmul %12, %11, %cst_18 {dimension_numbers = #tpu.dot_dimension_numbers<[1], [0], [0], [1], [0, 0, 1, 1], [], []>} : vector<8x32xf32>, vector<32x128xf32>, vector<8x128xf32> -> vector<8x128xf32>
    %21 = arith.addf %19, %20 : vector<8x128xf32>
    %22 = arith.negf %21 : vector<8x128xf32>
    %23 = math.exp %22 : vector<8x128xf32>
    %cst_19 = arith.constant 1.000000e+00 : f32
    %24 = vector.broadcast %cst_19 : f32 to vector<8x128xf32>
    %25 = arith.addf %24, %23 : vector<8x128xf32>
    %26 = arith.divf %24, %25 : vector<8x128xf32>
    %27 = math.tanh %21 : vector<8x128xf32>
    %28 = vector.extract_strided_slice %26 {offsets = [0, 0], sizes = [8, 32], strides = [1, 1]} : vector<8x128xf32> to vector<8x32xf32>
    %29 = vector.extract_strided_slice %26 {offsets = [0, 32], sizes = [8, 32], strides = [1, 1]} : vector<8x128xf32> to vector<8x32xf32>
    %30 = vector.extract_strided_slice %26 {offsets = [0, 96], sizes = [8, 32], strides = [1, 1]} : vector<8x128xf32> to vector<8x32xf32>
    %31 = vector.extract_strided_slice %27 {offsets = [0, 64], sizes = [8, 32], strides = [1, 1]} : vector<8x128xf32> to vector<8x32xf32>
    %32 = arith.mulf %29, %13 : vector<8x32xf32>
    %33 = arith.mulf %28, %31 : vector<8x32xf32>
    %34 = arith.addf %32, %33 : vector<8x32xf32>
    %35 = math.tanh %34 : vector<8x32xf32>
    %36 = arith.mulf %30, %35 : vector<8x32xf32>
    %c4_i32_20 = arith.constant 4 : i32
    %37 = arith.muli %c0_i32_15, %c4_i32_20 : i32
    %c1_i32 = arith.constant 1 : i32
    %38 = arith.addi %37, %c1_i32 : i32
    %c8_i32_21 = arith.constant 8 : i32
    %39 = arith.muli %38, %c8_i32_21 : i32
    %40 = tpu.assume_multiple %39, 8 : i32
    %41 = arith.index_cast %40 : i32 to index
    %c0_22 = arith.constant 0 : index
    %42 = vector.load %arg8[%41, %c0_22] : memref<64x128xf32, #tpu.memory_space<vmem>>, vector<8x128xf32>
    %cst_23 = arith.constant dense<0.000000e+00> : vector<8x128xf32>
    %43 = tpu.matmul %36, %11, %cst_23 {dimension_numbers = #tpu.dot_dimension_numbers<[1], [0], [0], [1], [0, 0, 1, 1], [], []>} : vector<8x32xf32>, vector<32x128xf32>, vector<8x128xf32> -> vector<8x128xf32>
    %44 = arith.addf %42, %43 : vector<8x128xf32>
    %45 = arith.negf %44 : vector<8x128xf32>
    %46 = math.exp %45 : vector<8x128xf32>
    %cst_24 = arith.constant 1.000000e+00 : f32
    %47 = vector.broadcast %cst_24 : f32 to vector<8x128xf32>
    %48 = arith.addf %47, %46 : vector<8x128xf32>
    %49 = arith.divf %47, %48 : vector<8x128xf32>
    %50 = math.tanh %44 : vector<8x128xf32>
    %51 = vector.extract_strided_slice %49 {offsets = [0, 0], sizes = [8, 32], strides = [1, 1]} : vector<8x128xf32> to vector<8x32xf32>
    %52 = vector.extract_strided_slice %49 {offsets = [0, 32], sizes = [8, 32], strides = [1, 1]} : vector<8x128xf32> to vector<8x32xf32>
    %53 = vector.extract_strided_slice %49 {offsets = [0, 96], sizes = [8, 32], strides = [1, 1]} : vector<8x128xf32> to vector<8x32xf32>
    %54 = vector.extract_strided_slice %50 {offsets = [0, 64], sizes = [8, 32], strides = [1, 1]} : vector<8x128xf32> to vector<8x32xf32>
    %55 = arith.mulf %52, %34 : vector<8x32xf32>
    %56 = arith.mulf %51, %54 : vector<8x32xf32>
    %57 = arith.addf %55, %56 : vector<8x32xf32>
    %58 = math.tanh %57 : vector<8x32xf32>
    %59 = arith.mulf %53, %58 : vector<8x32xf32>
    %c4_i32_25 = arith.constant 4 : i32
    %60 = arith.muli %c0_i32_15, %c4_i32_25 : i32
    %c2_i32 = arith.constant 2 : i32
    %61 = arith.addi %60, %c2_i32 : i32
    %c8_i32_26 = arith.constant 8 : i32
    %62 = arith.muli %61, %c8_i32_26 : i32
    %63 = tpu.assume_multiple %62, 8 : i32
    %64 = arith.index_cast %63 : i32 to index
    %c0_27 = arith.constant 0 : index
    %65 = vector.load %arg8[%64, %c0_27] : memref<64x128xf32, #tpu.memory_space<vmem>>, vector<8x128xf32>
    %cst_28 = arith.constant dense<0.000000e+00> : vector<8x128xf32>
    %66 = tpu.matmul %59, %11, %cst_28 {dimension_numbers = #tpu.dot_dimension_numbers<[1], [0], [0], [1], [0, 0, 1, 1], [], []>} : vector<8x32xf32>, vector<32x128xf32>, vector<8x128xf32> -> vector<8x128xf32>
    %67 = arith.addf %65, %66 : vector<8x128xf32>
    %68 = arith.negf %67 : vector<8x128xf32>
    %69 = math.exp %68 : vector<8x128xf32>
    %cst_29 = arith.constant 1.000000e+00 : f32
    %70 = vector.broadcast %cst_29 : f32 to vector<8x128xf32>
    %71 = arith.addf %70, %69 : vector<8x128xf32>
    %72 = arith.divf %70, %71 : vector<8x128xf32>
    %73 = math.tanh %67 : vector<8x128xf32>
    %74 = vector.extract_strided_slice %72 {offsets = [0, 0], sizes = [8, 32], strides = [1, 1]} : vector<8x128xf32> to vector<8x32xf32>
    %75 = vector.extract_strided_slice %72 {offsets = [0, 32], sizes = [8, 32], strides = [1, 1]} : vector<8x128xf32> to vector<8x32xf32>
    %76 = vector.extract_strided_slice %72 {offsets = [0, 96], sizes = [8, 32], strides = [1, 1]} : vector<8x128xf32> to vector<8x32xf32>
    %77 = vector.extract_strided_slice %73 {offsets = [0, 64], sizes = [8, 32], strides = [1, 1]} : vector<8x128xf32> to vector<8x32xf32>
    %78 = arith.mulf %75, %57 : vector<8x32xf32>
    %79 = arith.mulf %74, %77 : vector<8x32xf32>
    %80 = arith.addf %78, %79 : vector<8x32xf32>
    %81 = math.tanh %80 : vector<8x32xf32>
    %82 = arith.mulf %76, %81 : vector<8x32xf32>
    %c4_i32_30 = arith.constant 4 : i32
    %83 = arith.muli %c0_i32_15, %c4_i32_30 : i32
    %c3_i32 = arith.constant 3 : i32
    %84 = arith.addi %83, %c3_i32 : i32
    %c8_i32_31 = arith.constant 8 : i32
    %85 = arith.muli %84, %c8_i32_31 : i32
    %86 = tpu.assume_multiple %85, 8 : i32
    %87 = arith.index_cast %86 : i32 to index
    %c0_32 = arith.constant 0 : index
    %88 = vector.load %arg8[%87, %c0_32] : memref<64x128xf32, #tpu.memory_space<vmem>>, vector<8x128xf32>
    %cst_33 = arith.constant dense<0.000000e+00> : vector<8x128xf32>
    %89 = tpu.matmul %82, %11, %cst_33 {dimension_numbers = #tpu.dot_dimension_numbers<[1], [0], [0], [1], [0, 0, 1, 1], [], []>} : vector<8x32xf32>, vector<32x128xf32>, vector<8x128xf32> -> vector<8x128xf32>
    %90 = arith.addf %88, %89 : vector<8x128xf32>
    %91 = arith.negf %90 : vector<8x128xf32>
    %92 = math.exp %91 : vector<8x128xf32>
    %cst_34 = arith.constant 1.000000e+00 : f32
    %93 = vector.broadcast %cst_34 : f32 to vector<8x128xf32>
    %94 = arith.addf %93, %92 : vector<8x128xf32>
    %95 = arith.divf %93, %94 : vector<8x128xf32>
    %96 = math.tanh %90 : vector<8x128xf32>
    %97 = vector.extract_strided_slice %95 {offsets = [0, 0], sizes = [8, 32], strides = [1, 1]} : vector<8x128xf32> to vector<8x32xf32>
    %98 = vector.extract_strided_slice %95 {offsets = [0, 32], sizes = [8, 32], strides = [1, 1]} : vector<8x128xf32> to vector<8x32xf32>
    %99 = vector.extract_strided_slice %95 {offsets = [0, 96], sizes = [8, 32], strides = [1, 1]} : vector<8x128xf32> to vector<8x32xf32>
    %100 = vector.extract_strided_slice %96 {offsets = [0, 64], sizes = [8, 32], strides = [1, 1]} : vector<8x128xf32> to vector<8x32xf32>
    %101 = arith.mulf %98, %80 : vector<8x32xf32>
    %102 = arith.mulf %97, %100 : vector<8x32xf32>
    %103 = arith.addf %101, %102 : vector<8x32xf32>
    %104 = math.tanh %103 : vector<8x32xf32>
    %105 = arith.mulf %99, %104 : vector<8x32xf32>
    %106 = tpu.concatenate %36, %59, %82, %105 in 1 : vector<8x32xf32>, vector<8x32xf32>, vector<8x32xf32>, vector<8x32xf32> -> vector<8x128xf32>
    %107 = arith.index_cast %c0_i32_15 : i32 to index
    %c0_35 = arith.constant 0 : index
    %c0_36 = arith.constant 0 : index
    %108 = vector.load %arg7[%107, %c0_35, %c0_36] : memref<2x8x128xf32, #tpu.memory_space<vmem>>, vector<1x8x128xf32>
    %109 = vector.shape_cast %108 : vector<1x8x128xf32> to vector<8x128xf32>
    %110 = vector.shape_cast %106 : vector<8x128xf32> to vector<1x8x128xf32>
    tpu.vector_store %arg7[%107, %c0_35, %c0_36], %110 {strides = array<i32>} : memref<2x8x128xf32, #tpu.memory_space<vmem>>, vector<1x8x128xf32>,
    %c1_i32_37 = arith.constant 1 : i32
    %c4_i32_38 = arith.constant 4 : i32
    %111 = arith.muli %c1_i32_37, %c4_i32_38 : i32
    %c0_i32_39 = arith.constant 0 : i32
    %112 = arith.addi %111, %c0_i32_39 : i32
    %c8_i32_40 = arith.constant 8 : i32
    %113 = arith.muli %112, %c8_i32_40 : i32
    %114 = tpu.assume_multiple %113, 8 : i32
    %115 = arith.index_cast %114 : i32 to index
    %c0_41 = arith.constant 0 : index
    %116 = vector.load %arg8[%115, %c0_41] : memref<64x128xf32, #tpu.memory_space<vmem>>, vector<8x128xf32>
    %cst_42 = arith.constant dense<0.000000e+00> : vector<8x128xf32>
    %117 = tpu.matmul %105, %11, %cst_42 {dimension_numbers = #tpu.dot_dimension_numbers<[1], [0], [0], [1], [0, 0, 1, 1], [], []>} : vector<8x32xf32>, vector<32x128xf32>, vector<8x128xf32> -> vector<8x128xf32>
    %118 = arith.addf %116, %117 : vector<8x128xf32>
    %119 = arith.negf %118 : vector<8x128xf32>
    %120 = math.exp %119 : vector<8x128xf32>
    %cst_43 = arith.constant 1.000000e+00 : f32
    %121 = vector.broadcast %cst_43 : f32 to vector<8x128xf32>
    %122 = arith.addf %121, %120 : vector<8x128xf32>
    %123 = arith.divf %121, %122 : vector<8x128xf32>
    %124 = math.tanh %118 : vector<8x128xf32>
    %125 = vector.extract_strided_slice %123 {offsets = [0, 0], sizes = [8, 32], strides = [1, 1]} : vector<8x128xf32> to vector<8x32xf32>
    %126 = vector.extract_strided_slice %123 {offsets = [0, 32], sizes = [8, 32], strides = [1, 1]} : vector<8x128xf32> to vector<8x32xf32>
    %127 = vector.extract_strided_slice %123 {offsets = [0, 96], sizes = [8, 32], strides = [1, 1]} : vector<8x128xf32> to vector<8x32xf32>
    %128 = vector.extract_strided_slice %124 {offsets = [0, 64], sizes = [8, 32], strides = [1, 1]} : vector<8x128xf32> to vector<8x32xf32>
    %129 = arith.mulf %126, %103 : vector<8x32xf32>
    %130 = arith.mulf %125, %128 : vector<8x32xf32>
    %131 = arith.addf %129, %130 : vector<8x32xf32>
    %132 = math.tanh %131 : vector<8x32xf32>
    %133 = arith.mulf %127, %132 : vector<8x32xf32>
    %c4_i32_44 = arith.constant 4 : i32
    %134 = arith.muli %c1_i32_37, %c4_i32_44 : i32
    %c1_i32_45 = arith.constant 1 : i32
    %135 = arith.addi %134, %c1_i32_45 : i32
    %c8_i32_46 = arith.constant 8 : i32
    %136 = arith.muli %135, %c8_i32_46 : i32
    %137 = tpu.assume_multiple %136, 8 : i32
    %138 = arith.index_cast %137 : i32 to index
    %c0_47 = arith.constant 0 : index
    %139 = vector.load %arg8[%138, %c0_47] : memref<64x128xf32, #tpu.memory_space<vmem>>, vector<8x128xf32>
    %cst_48 = arith.constant dense<0.000000e+00> : vector<8x128xf32>
    %140 = tpu.matmul %133, %11, %cst_48 {dimension_numbers = #tpu.dot_dimension_numbers<[1], [0], [0], [1], [0, 0, 1, 1], [], []>} : vector<8x32xf32>, vector<32x128xf32>, vector<8x128xf32> -> vector<8x128xf32>
    %141 = arith.addf %139, %140 : vector<8x128xf32>
    %142 = arith.negf %141 : vector<8x128xf32>
    %143 = math.exp %142 : vector<8x128xf32>
    %cst_49 = arith.constant 1.000000e+00 : f32
    %144 = vector.broadcast %cst_49 : f32 to vector<8x128xf32>
    %145 = arith.addf %144, %143 : vector<8x128xf32>
    %146 = arith.divf %144, %145 : vector<8x128xf32>
    %147 = math.tanh %141 : vector<8x128xf32>
    %148 = vector.extract_strided_slice %146 {offsets = [0, 0], sizes = [8, 32], strides = [1, 1]} : vector<8x128xf32> to vector<8x32xf32>
    %149 = vector.extract_strided_slice %146 {offsets = [0, 32], sizes = [8, 32], strides = [1, 1]} : vector<8x128xf32> to vector<8x32xf32>
    %150 = vector.extract_strided_slice %146 {offsets = [0, 96], sizes = [8, 32], strides = [1, 1]} : vector<8x128xf32> to vector<8x32xf32>
    %151 = vector.extract_strided_slice %147 {offsets = [0, 64], sizes = [8, 32], strides = [1, 1]} : vector<8x128xf32> to vector<8x32xf32>
    %152 = arith.mulf %149, %131 : vector<8x32xf32>
    %153 = arith.mulf %148, %151 : vector<8x32xf32>
    %154 = arith.addf %152, %153 : vector<8x32xf32>
    %155 = math.tanh %154 : vector<8x32xf32>
    %156 = arith.mulf %150, %155 : vector<8x32xf32>
    %c4_i32_50 = arith.constant 4 : i32
    %157 = arith.muli %c1_i32_37, %c4_i32_50 : i32
    %c2_i32_51 = arith.constant 2 : i32
    %158 = arith.addi %157, %c2_i32_51 : i32
    %c8_i32_52 = arith.constant 8 : i32
    %159 = arith.muli %158, %c8_i32_52 : i32
    %160 = tpu.assume_multiple %159, 8 : i32
    %161 = arith.index_cast %160 : i32 to index
    %c0_53 = arith.constant 0 : index
    %162 = vector.load %arg8[%161, %c0_53] : memref<64x128xf32, #tpu.memory_space<vmem>>, vector<8x128xf32>
    %cst_54 = arith.constant dense<0.000000e+00> : vector<8x128xf32>
    %163 = tpu.matmul %156, %11, %cst_54 {dimension_numbers = #tpu.dot_dimension_numbers<[1], [0], [0], [1], [0, 0, 1, 1], [], []>} : vector<8x32xf32>, vector<32x128xf32>, vector<8x128xf32> -> vector<8x128xf32>
    %164 = arith.addf %162, %163 : vector<8x128xf32>
    %165 = arith.negf %164 : vector<8x128xf32>
    %166 = math.exp %165 : vector<8x128xf32>
    %cst_55 = arith.constant 1.000000e+00 : f32
    %167 = vector.broadcast %cst_55 : f32 to vector<8x128xf32>
    %168 = arith.addf %167, %166 : vector<8x128xf32>
    %169 = arith.divf %167, %168 : vector<8x128xf32>
    %170 = math.tanh %164 : vector<8x128xf32>
    %171 = vector.extract_strided_slice %169 {offsets = [0, 0], sizes = [8, 32], strides = [1, 1]} : vector<8x128xf32> to vector<8x32xf32>
    %172 = vector.extract_strided_slice %169 {offsets = [0, 32], sizes = [8, 32], strides = [1, 1]} : vector<8x128xf32> to vector<8x32xf32>
    %173 = vector.extract_strided_slice %169 {offsets = [0, 96], sizes = [8, 32], strides = [1, 1]} : vector<8x128xf32> to vector<8x32xf32>
    %174 = vector.extract_strided_slice %170 {offsets = [0, 64], sizes = [8, 32], strides = [1, 1]} : vector<8x128xf32> to vector<8x32xf32>
    %175 = arith.mulf %172, %154 : vector<8x32xf32>
    %176 = arith.mulf %171, %174 : vector<8x32xf32>
    %177 = arith.addf %175, %176 : vector<8x32xf32>
    %178 = math.tanh %177 : vector<8x32xf32>
    %179 = arith.mulf %173, %178 : vector<8x32xf32>
    %c4_i32_56 = arith.constant 4 : i32
    %180 = arith.muli %c1_i32_37, %c4_i32_56 : i32
    %c3_i32_57 = arith.constant 3 : i32
    %181 = arith.addi %180, %c3_i32_57 : i32
    %c8_i32_58 = arith.constant 8 : i32
    %182 = arith.muli %181, %c8_i32_58 : i32
    %183 = tpu.assume_multiple %182, 8 : i32
    %184 = arith.index_cast %183 : i32 to index
    %c0_59 = arith.constant 0 : index
    %185 = vector.load %arg8[%184, %c0_59] : memref<64x128xf32, #tpu.memory_space<vmem>>, vector<8x128xf32>
    %cst_60 = arith.constant dense<0.000000e+00> : vector<8x128xf32>
    %186 = tpu.matmul %179, %11, %cst_60 {dimension_numbers = #tpu.dot_dimension_numbers<[1], [0], [0], [1], [0, 0, 1, 1], [], []>} : vector<8x32xf32>, vector<32x128xf32>, vector<8x128xf32> -> vector<8x128xf32>
    %187 = arith.addf %185, %186 : vector<8x128xf32>
    %188 = arith.negf %187 : vector<8x128xf32>
    %189 = math.exp %188 : vector<8x128xf32>
    %cst_61 = arith.constant 1.000000e+00 : f32
    %190 = vector.broadcast %cst_61 : f32 to vector<8x128xf32>
    %191 = arith.addf %190, %189 : vector<8x128xf32>
    %192 = arith.divf %190, %191 : vector<8x128xf32>
    %193 = math.tanh %187 : vector<8x128xf32>
    %194 = vector.extract_strided_slice %192 {offsets = [0, 0], sizes = [8, 32], strides = [1, 1]} : vector<8x128xf32> to vector<8x32xf32>
    %195 = vector.extract_strided_slice %192 {offsets = [0, 32], sizes = [8, 32], strides = [1, 1]} : vector<8x128xf32> to vector<8x32xf32>
    %196 = vector.extract_strided_slice %192 {offsets = [0, 96], sizes = [8, 32], strides = [1, 1]} : vector<8x128xf32> to vector<8x32xf32>
    %197 = vector.extract_strided_slice %193 {offsets = [0, 64], sizes = [8, 32], strides = [1, 1]} : vector<8x128xf32> to vector<8x32xf32>
    %198 = arith.mulf %195, %177 : vector<8x32xf32>
    %199 = arith.mulf %194, %197 : vector<8x32xf32>
    %200 = arith.addf %198, %199 : vector<8x32xf32>
    %201 = math.tanh %200 : vector<8x32xf32>
    %202 = arith.mulf %196, %201 : vector<8x32xf32>
    %203 = tpu.concatenate %133, %156, %179, %202 in 1 : vector<8x32xf32>, vector<8x32xf32>, vector<8x32xf32>, vector<8x32xf32> -> vector<8x128xf32>
    %204 = arith.index_cast %c1_i32_37 : i32 to index
    %c0_62 = arith.constant 0 : index
    %c0_63 = arith.constant 0 : index
    %205 = vector.load %arg7[%204, %c0_62, %c0_63] : memref<2x8x128xf32, #tpu.memory_space<vmem>>, vector<1x8x128xf32>
    %206 = vector.shape_cast %205 : vector<1x8x128xf32> to vector<8x128xf32>
    %207 = vector.shape_cast %203 : vector<8x128xf32> to vector<1x8x128xf32>
    tpu.vector_store %arg7[%204, %c0_62, %c0_63], %207 {strides = array<i32>} : memref<2x8x128xf32, #tpu.memory_space<vmem>>, vector<1x8x128xf32>,
    %c2_i32_64 = arith.constant 2 : i32
    %c0_65 = arith.constant 0 : index
    %c0_66 = arith.constant 0 : index
    %208 = vector.load %arg9[%c0_65, %c0_66] : memref<8x32xf32, #tpu.memory_space<vmem>>, vector<8x32xf32>
    tpu.vector_store %arg9[%c0_65, %c0_66], %202 {strides = array<i32>} : memref<8x32xf32, #tpu.memory_space<vmem>>, vector<8x32xf32>,
    %c0_67 = arith.constant 0 : index
    %c0_68 = arith.constant 0 : index
    %209 = vector.load %arg10[%c0_67, %c0_68] : memref<8x32xf32, #tpu.memory_space<vmem>>, vector<8x32xf32>
    tpu.vector_store %arg10[%c0_67, %c0_68], %200 {strides = array<i32>} : memref<8x32xf32, #tpu.memory_space<vmem>>, vector<8x32xf32>,
    return
  }
  func.func @transform_0(%arg0: i32) -> (i32, i32, i32) {
    %c0_i32 = arith.constant 0 : i32
    %c0_i32_0 = arith.constant 0 : i32
    %c0_i32_1 = arith.constant 0 : i32
    return %arg0, %c0_i32, %c0_i32_0 : i32, i32, i32
  }
  func.func @transform_1(%arg0: i32) -> (i32, i32) {
    %c0_i32 = arith.constant 0 : i32
    %c0_i32_0 = arith.constant 0 : i32
    %c0_i32_1 = arith.constant 0 : i32
    return %c0_i32, %c0_i32_0 : i32, i32
  }
  func.func @transform_2(%arg0: i32) -> (i32, i32) {
    %c0_i32 = arith.constant 0 : i32
    %c0_i32_0 = arith.constant 0 : i32
    %c0_i32_1 = arith.constant 0 : i32
    return %c0_i32, %c0_i32_0 : i32, i32
  }
  func.func @transform_3(%arg0: i32) -> (i32, i32) {
    %c0_i32 = arith.constant 0 : i32
    %c0_i32_0 = arith.constant 0 : i32
    %c0_i32_1 = arith.constant 0 : i32
    return %c0_i32, %c0_i32_0 : i32, i32
  }
  func.func @transform_4(%arg0: i32) -> (i32, i32) {
    %c0_i32 = arith.constant 0 : i32
    %c0_i32_0 = arith.constant 0 : i32
    %c0_i32_1 = arith.constant 0 : i32
    return %c0_i32, %c0_i32_0 : i32, i32
  }
  func.func @transform_5(%arg0: i32) -> (i32, i32) {
    %c0_i32 = arith.constant 0 : i32
    %c0_i32_0 = arith.constant 0 : i32
    %c0_i32_1 = arith.constant 0 : i32
    return %c0_i32, %c0_i32_0 : i32, i32
  }
  func.func @transform_6(%arg0: i32) -> (i32, i32, i32) {
    %c0_i32 = arith.constant 0 : i32
    %c0_i32_0 = arith.constant 0 : i32
    %c0_i32_1 = arith.constant 0 : i32
    return %arg0, %c0_i32, %c0_i32_0 : i32, i32, i32
  }
}

</mosaic_0001>

<bundles_post_ra>
// kernel: lstm_forward.1
= control target key start
LH: loop header
LB: loop body
LE: loop exit
PB: predicated region body
PF: predicated region fallthrough
CT: control target
= control target key end

     0   :  { %vm73_vm0 = vcmask 1043456   ;;  %vm48_vm1 = vcmask 31744   ;;  %v1349_v0 = vmov 0.0|0.0   ;;  %vm28_vm2 = vcmask 261120   ;;  %s1352_s14 = smov 64   ;;  %s1605_s4 = inlined_call_operand.vmem [shape: f32[32,128], index: 4, kind: input, shape index: {}]   ;;  %s1606_s3 = inlined_call_operand.vmem [shape: f32[4,128], index: 3, kind: input, shape index: {}]   ;;  %s1607_s0 = inlined_call_operand.vmem [shape: f32[1,64,4], index: 0, kind: input, shape index: {}]   ;;  %s1608_s1 = inlined_call_operand.vmem [shape: f32[8,32], index: 1, kind: input, shape index: {}]   ;;  %s1609_s2 = inlined_call_operand.vmem [shape: f32[8,32], index: 2, kind: input, shape index: {}]   ;;  %s1610_s5 = inlined_call_operand.vmem [shape: f32[1,128], index: 5, kind: input, shape index: {}]   ;;  %s1611_s6 = inlined_call_operand.vmem [shape: f32[2,8,128], index: 6, kind: output, shape index: {}]  }
   0x1   :  { %1231 = vmatprep.subr.bf16.mxu1 %v1349_v0  ;;  %v190_v1 = vld [vmem:[%s1605_s4] sm:$0xff]  ;;  %v191_v2 = vld [vmem:[%s1605_s4 + $0x8] sm:$0xff]  ;;  %v192_v7 = vld [vmem:[%s1605_s4 + $0x10] sm:$0xff]  ;;  %vm1350_vm3 = vmmov 0   ;;  %v1351_v8 = vmov 0.0   ;;  %vm614_vm4 = vcmask 523264  }
   0x2   :  { %v40_v3 = vld [vmem:[%s1606_s3] sm:$0xf]  ;;  %v1400_v4 = vpack.c.bf16 %v191_v2, %v190_v1  ;;  %v33_v6 = vld [vmem:[%s1607_s0 + $0x8] sm:$0xff]  ;;  %1151 = vmatprep.mubr.msk.f32.mxu1 %vm1350_vm3, %v1351_v8  ;;  %v193_v9 = vld [vmem:[%s1605_s4 + $0x18] sm:$0xff]  ;;  %vm616_vm5 = vcmask 785408  }
   0x3   :  { %1129 = vmatprep.subr.msk.mxu0 %vm73_vm0, %v40_v3  ;;  %v32_v5 = vld [vmem:[%s1607_s0] sm:$0xff]  ;;  %v1424_v11 = vpack.c.bf16 %v193_v9, %v192_v7  ;;  %v34_v51 = vld [vmem:[%s1607_s0 + $0x10] sm:$0xff]  ;;  %v35_v52 = vld [vmem:[%s1607_s0 + $0x18] sm:$0xff] }
   0x4   :  { %1130 = vmatpush3.msk.msra.mxu0 %vm73_vm0, %v40_v3  ;;  %1131 = vmatprep.mubr.msk.f32.mxu0 %vm48_vm1, %v32_v5  ;;  %v27_v10 = vld [vmem:[%s1608_s1] sm:$0xff]  ;;  %v37_v54 = vld [vmem:[%s1607_s0 + $0x28] sm:$0xff]  ;;  %v38_v55 = vld [vmem:[%s1607_s0 + $0x30] sm:$0xff] }
   0x5   :  { %1233 = vmatpush3.bf16.msra.mxu1 %v1400_v4  ;;  %1132 = vmatmul.mubr.msk.f32.vlgmr.msra.gmra.mrb[0].mxu0 %vm48_vm1, %v33_v6  ;;  %29 = vst.msk [vmem:[#allocation3] sm:$0xff] %vm28_vm2, %v27_v10  ;;  %v30_v13 = vld [vmem:[%s1609_s2] sm:$0xff]  ;;  %s1353_s2 = smov 32   ;;  %v39_v56 = vld [vmem:[%s1607_s0 + $0x38] sm:$0xff] }
   0x6   :  { %1234 = vmatprep.subr.bf16.mxu1 %v1349_v0  ;;  %1243 = vmatprep.subr.bf16.mxu0 %v1349_v0  ;;  %31 = vst.msk [vmem:[#allocation4] sm:$0xff] %vm28_vm2, %v30_v13  ;;  %v1449_v16 = vld [vmem:[%s1610_s5] ss:$0 sm:$0xff] }
   0x7   :  { %1245 = vmatpush3.bf16.msra.mxu0 %v1400_v4  ;;  %v36_v53 = vld [vmem:[%s1607_s0 + $0x20] sm:$0xff]  ;;  %1134 = vmatprep.mubr.msk.f32.mxu0 %vm48_vm1, %v34_v51  ;;  %s1354_s0 = smov 96  }
   0x8   :  { %1246 = vmatprep.subr.bf16.mxu0 %v1349_v0 }
   0x9   :  { %1236 = vmatpush3.bf16.msra.mxu1 %v1424_v11  ;;  %1135 = vmatmul.mubr.msk.f32.gmra.mrb[2].mxu0 %vm48_vm1, %v35_v52 }
   0xa   :  { %1237 = vmatprep.subr.bf16.mxu1 %v1349_v0  ;;  %1137 = vmatprep.mubr.msk.f32.mxu0 %vm48_vm1, %v36_v53 }
   0xb   :  { %1248 = vmatpush3.bf16.msra.mxu0 %v1424_v11 }
   0xc   :  { %v194_v12 = vld [vmem:[#allocation3] sm:$0xff]  ;;  %1255 = vmatprep.subr.bf16.mxu0 %v1349_v0 }
   0xd   :  { %1152 = vmatmul.mubr.msk.f32.vlgmr.msra.gmra.mrb[0].mxu1 %vm28_vm2, %v194_v12  ;;  %v195_v22 = vld [vmem:[#allocation4] sm:$0xff]  ;;  %1138 = vmatmul.mubr.msk.f32.gmra.mrb[4].mxu0 %vm48_vm1, %v37_v54 }
   0xe   :  { %1239 = vmatpush3.bf16.msra.mxu1 %v1400_v4  ;;  %1162 = vmatprep.mubr.msk.f32.mxu1 %vm1350_vm3, %v1351_v8 }
   0xf   :  { %1240 = vmatprep.subr.bf16.mxu1 %v1349_v0  ;;  %1140 = vmatprep.mubr.msk.f32.mxu0 %vm48_vm1, %v38_v55 }
  0x11   :  { %1141 = vmatmul.mubr.msk.f32.gmra.mrb[6].mxu0 %vm48_vm1, %v39_v56 }
  0x12   :  { %1242 = vmatpush3.bf16.msra.mxu1 %v1424_v11  ;;  %1173 = vmatprep.mubr.msk.f32.mxu0 %vm1350_vm3, %v1351_v8 }
  0x13   :  { %1249 = vmatprep.subr.bf16.mxu1 %v1349_v0 }
  0xd8   :  { %v1133_v14 = vpop.f32.mrb[0].mxu0 }
  0xd9   :  { %v143_v15 = vpop.f32.mrb[1].mxu0  ;;  %v149_v37 = vadd.f32 %v1133_v14, %v1449_v16 }
  0xda   :  { %v144_v17 = vadd.f32 %v1449_v16, %v143_v15 }
  0xdc   :  { %v1136_v60 = vpop.f32.mrb[2].mxu0 }
  0xdd   :  { %v153_v61 = vpop.f32.mrb[3].mxu0 }
  0xde   :  { %v154_v5 = vadd.f32 %v1449_v16, %v153_v61 }
  0xe0   :  { %v267_v18 = vpop.f32.mrb[0].mxu1  ;;  %v1501_v62 = vpop.f32.mrb[4].mxu0 }
  0xe1   :  { %v271_v19 = vadd.f32 %v267_v18, %v144_v17  ;;  %v1153_v20 = vpop.f32.mrb[1].mxu1  ;;  %v1503_v63 = vpop.f32.mrb[5].mxu0 }
  0xe3   :  { %1285 = vtanh.f32 %v271_v19  ;;  %v1064_v23 = vmul.f32 -1.442695, %v271_v19 }
  0xe4   :  { %v1505_v1 = vpop.f32.mrb[6].mxu0 }
  0xe5   :  { %1287 = vpow2.f32 %v1064_v23  ;;  %v1507_v2 = vpop.f32.mrb[7].mxu0 }
  0xed   :  { %v1286_v21 = vpop.eup %1285 }
  0xee   :  { %285 = vrot.lane.b32.xlu0 %v1286_v21, %s1352_s14 }
  0xef   :  { %v1288_v24 = vpop.eup %1287 }
  0xf0   :  { %v275_v25 = vadd.f32 1.0, %v1288_v24 }
  0xf2   :  { %280 = vrot.lane.b32.xlu0 %v195_v22, %s1353_s2  ;;  %1289 = vrcp.f32 %v275_v25 }
  0xfc   :  { %v1290_v26 = vpop.eup %1289 }
 0x160   :  { %v286_v27 = vpop.permute.xlu0 %285 }
 0x161   :  { %v288_v28 = vmul.f32 %v1290_v26, %v286_v27 }
 0x163   :  { %290 = vrot.lane.b32.xlu1 %v288_v28, %s1353_s2 }
 0x164   :  { %v281_v29 = vpop.permute.xlu0 %280 }
 0x165   :  { %v283_v30 = vmul.f32 %v1290_v26, %v281_v29 }
 0x1d5   :  { %v291_v31 = vpop.permute.xlu1 %290 }
 0x1d6   :  { %v293_v32 = vadd.f32 %v291_v31, %v283_v30 }
 0x1d8   :  { %1291 = vtanh.f32 %v293_v32 }
 0x1e2   :  { %v1292_v33 = vpop.eup %1291 }
 0x1e3   :  { %296 = vrot.lane.b32.xlu1 %v1292_v33, %s1352_s14 }
 0x255   :  { %v297_v34 = vpop.permute.xlu1 %296 }
 0x256   :  { %v299_v35 = vmul.f32 %v1290_v26, %v297_v34  ;;  %v159_v26 = vadd.f32 %v1136_v60, %v1449_v16 }
 0x258   :  { %303 = vrot.lane.b32.xlu0 %v299_v35, %s1353_s2 }
 0x2ca   :  { %v1457_v36 = vpop.permute.xlu0 %303 }
 0x2cb   :  { %1163 = vmatmul.mubr.msk.f32.vlgmr.msra.gmra.mrb[2].mxu1 %vm28_vm2, %v1457_v36 }
 0x2cc   :  { %1251 = vmatpush3.bf16.msra.mxu1 %v1400_v4  ;;  %1184 = vmatprep.mubr.msk.f32.mxu1 %vm1350_vm3, %v1351_v8 }
 0x2cd   :  { %1252 = vmatprep.subr.bf16.mxu1 %v1349_v0 }
 0x2d0   :  { %1254 = vmatpush3.bf16.msra.mxu1 %v1424_v11 }
 0x2d1   :  { %1261 = vmatprep.subr.bf16.mxu1 %v1349_v0 }
 0x39e   :  { %v373_v38 = vpop.f32.mrb[2].mxu1 }
 0x39f   :  { %v377_v39 = vadd.f32 %v373_v38, %v149_v37  ;;  %v1164_v40 = vpop.f32.mrb[3].mxu1 }
 0x3a1   :  { %1293 = vtanh.f32 %v377_v39  ;;  %v1066_v42 = vmul.f32 -1.442695, %v377_v39 }
 0x3a3   :  { %1295 = vpow2.f32 %v1066_v42 }
 0x3ab   :  { %v1294_v41 = vpop.eup %1293 }
 0x3ac   :  { %387 = vrot.lane.b32.xlu1 %v1294_v41, %s1352_s14 }
 0x3ad   :  { %v1296_v43 = vpop.eup %1295 }
 0x3ae   :  { %v381_v44 = vadd.f32 1.0, %v1296_v43 }
 0x3b0   :  { %1297 = vrcp.f32 %v381_v44 }
 0x3ba   :  { %v1298_v45 = vpop.eup %1297 }
 0x3bb   :  { %v385_v48 = vmul.f32 %v1298_v45, %v293_v32 }
 0x41e   :  { %v388_v46 = vpop.permute.xlu1 %387 }
 0x41f   :  { %v390_v47 = vmul.f32 %v1298_v45, %v388_v46 }
 0x421   :  { %392 = vrot.lane.b32.xlu0 %v390_v47, %s1353_s2 }
 0x493   :  { %v393_v49 = vpop.permute.xlu0 %392 }
 0x494   :  { %v395_v50 = vadd.f32 %v393_v49, %v385_v48 }
 0x496   :  { %1299 = vtanh.f32 %v395_v50 }
 0x4a0   :  { %v1300_v57 = vpop.eup %1299 }
 0x4a1   :  { %398 = vrot.lane.b32.xlu1 %v1300_v57, %s1352_s14 }
 0x513   :  { %v399_v58 = vpop.permute.xlu1 %398 }
 0x514   :  { %v1497_v59 = vmul.f32 %v1298_v45, %v399_v58  ;;  %v164_v45 = vadd.f32 %v1449_v16, %v1503_v63 }
 0x516   :  { %405 = vrot.lane.b32.xlu0 %v1497_v59, %s1353_s2 }
 0x588   :  { %v406_v3 = vpop.permute.xlu0 %405 }
 0x589   :  { %1174 = vmatmul.mubr.msk.f32.vlgmr.msra.gmra.mrb[8].mxu0 %vm28_vm2, %v406_v3 }
 0x58a   :  { %1257 = vmatpush3.bf16.msra.mxu0 %v1400_v4  ;;  %1195 = vmatprep.mubr.msk.f32.mxu0 %vm1350_vm3, %v1351_v8 }
 0x58b   :  { %1258 = vmatprep.subr.bf16.mxu0 %v1349_v0 }
 0x58e   :  { %1260 = vmatpush3.bf16.msra.mxu0 %v1424_v11 }
 0x58f   :  { %1267 = vmatprep.subr.bf16.mxu0 %v1349_v0 }
 0x65c   :  { %v475_v6 = vpop.f32.mrb[8].mxu0 }
 0x65d   :  { %v479_v7 = vadd.f32 %v475_v6, %v154_v5  ;;  %v1175_v9 = vpop.f32.mrb[9].mxu0  ;;  %v169_v5 = vadd.f32 %v1501_v62, %v1449_v16 }
 0x65f   :  { %1301 = vtanh.f32 %v479_v7  ;;  %v1068_v12 = vmul.f32 -1.442695, %v479_v7 }
 0x661   :  { %1303 = vpow2.f32 %v1068_v12 }
 0x669   :  { %v1302_v10 = vpop.eup %1301 }
 0x66a   :  { %489 = vrot.lane.b32.xlu1 %v1302_v10, %s1352_s14 }
 0x66b   :  { %v1304_v13 = vpop.eup %1303 }
 0x66c   :  { %v483_v14 = vadd.f32 1.0, %v1304_v13 }
 0x66e   :  { %1305 = vrcp.f32 %v483_v14 }
 0x678   :  { %v1306_v15 = vpop.eup %1305 }
 0x679   :  { %v487_v19 = vmul.f32 %v1306_v15, %v395_v50 }
 0x6dc   :  { %v490_v17 = vpop.permute.xlu1 %489 }
 0x6dd   :  { %v492_v18 = vmul.f32 %v1306_v15, %v490_v17 }
 0x6df   :  { %494 = vrot.lane.b32.xlu0 %v492_v18, %s1353_s2 }
 0x751   :  { %v495_v20 = vpop.permute.xlu0 %494 }
 0x752   :  { %v497_v21 = vadd.f32 %v495_v20, %v487_v19 }
 0x754   :  { %1307 = vtanh.f32 %v497_v21 }
 0x75e   :  { %v1308_v22 = vpop.eup %1307 }
 0x75f   :  { %500 = vrot.lane.b32.xlu1 %v1308_v22, %s1352_s14 }
 0x7d1   :  { %v501_v23 = vpop.permute.xlu1 %500 }
 0x7d2   :  { %v1520_v24 = vmul.f32 %v1306_v15, %v501_v23 }
 0x7d4   :  { %507 = vrot.lane.b32.xlu0 %v1520_v24, %s1353_s2 }
 0x846   :  { %v508_v25 = vpop.permute.xlu0 %507 }
 0x847   :  { %1185 = vmatmul.mubr.msk.f32.vlgmr.msra.gmra.mrb[4].mxu1 %vm28_vm2, %v508_v25 }
 0x848   :  { %1263 = vmatpush3.bf16.msra.mxu1 %v1400_v4  ;;  %1206 = vmatprep.mubr.msk.f32.mxu1 %vm1350_vm3, %v1351_v8 }
 0x849   :  { %1264 = vmatprep.subr.bf16.mxu1 %v1349_v0 }
 0x84c   :  { %1266 = vmatpush3.bf16.msra.mxu1 %v1424_v11 }
 0x84d   :  { %1273 = vmatprep.subr.bf16.mxu1 %v1349_v0 }
 0x91a   :  { %v577_v27 = vpop.f32.mrb[4].mxu1 }
 0x91b   :  { %v581_v28 = vadd.f32 %v577_v27, %v159_v26  ;;  %v1186_v29 = vpop.f32.mrb[5].mxu1 }
 0x91d   :  { %1309 = vtanh.f32 %v581_v28  ;;  %v1070_v31 = vmul.f32 -1.442695, %v581_v28 }
 0x91f   :  { %1311 = vpow2.f32 %v1070_v31 }
 0x927   :  { %v1310_v30 = vpop.eup %1309 }
 0x928   :  { %591 = vrot.lane.b32.xlu1 %v1310_v30, %s1352_s14 }
 0x929   :  { %v1312_v32 = vpop.eup %1311 }
 0x92a   :  { %v585_v33 = vadd.f32 1.0, %v1312_v32 }
 0x92c   :  { %1313 = vrcp.f32 %v585_v33 }
 0x936   :  { %v1314_v34 = vpop.eup %1313 }
 0x937   :  { %v589_v38 = vmul.f32 %v1314_v34, %v497_v21  ;;  %v174_v21 = vadd.f32 %v1449_v16, %v1507_v2 }
 0x99a   :  { %v592_v35 = vpop.permute.xlu1 %591 }
 0x99b   :  { %v594_v37 = vmul.f32 %v1314_v34, %v592_v35 }
 0x99d   :  { %596 = vrot.lane.b32.xlu0 %v594_v37, %s1353_s2 }
 0xa0f   :  { %v597_v39 = vpop.permute.xlu0 %596 }
 0xa10   :  { %v599_v40 = vadd.f32 %v597_v39, %v589_v38 }
 0xa12   :  { %1315 = vtanh.f32 %v599_v40 }
 0xa1c   :  { %v1316_v41 = vpop.eup %1315 }
 0xa1d   :  { %602 = vrot.lane.b32.xlu1 %v1316_v41, %s1352_s14 }
 0xa8f   :  { %v603_v42 = vpop.permute.xlu1 %602 }
 0xa90   :  { %v1535_v43 = vmul.f32 %v1314_v34, %v603_v42 }
 0xa92   :  { %622 = vrot.lane.b32.xlu0 %v1535_v43, %s1353_s2 }
 0xb04   :  { %v623_v44 = vpop.permute.xlu0 %622 }
 0xb05   :  { %1196 = vmatmul.mubr.msk.f32.vlgmr.msra.gmra.mrb[10].mxu0 %vm28_vm2, %v623_v44 }
 0xb06   :  { %1269 = vmatpush3.bf16.msra.mxu0 %v1400_v4  ;;  %1217 = vmatprep.mubr.msk.f32.mxu0 %vm1350_vm3, %v1351_v8 }
 0xb07   :  { %1270 = vmatprep.subr.bf16.mxu0 %v1349_v0 }
 0xb0a   :  { %1272 = vmatpush3.bf16.msra.mxu0 %v1424_v11 }
 0xbd8   :  { %v692_v46 = vpop.f32.mrb[10].mxu0 }
 0xbd9   :  { %v696_v47 = vadd.f32 %v692_v46, %v164_v45  ;;  %v1197_v48 = vpop.f32.mrb[11].mxu0 }
 0xbdb   :  { %1317 = vtanh.f32 %v696_v47  ;;  %v1072_v50 = vmul.f32 -1.442695, %v696_v47 }
 0xbdd   :  { %1319 = vpow2.f32 %v1072_v50 }
 0xbe5   :  { %v1318_v49 = vpop.eup %1317 }
 0xbe6   :  { %706 = vrot.lane.b32.xlu1 %v1318_v49, %s1352_s14 }
 0xbe7   :  { %v1320_v51 = vpop.eup %1319 }
 0xbe8   :  { %v700_v52 = vadd.f32 1.0, %v1320_v51 }
 0xbea   :  { %1321 = vrcp.f32 %v700_v52 }
 0xbf4   :  { %v1322_v53 = vpop.eup %1321 }
 0xbf5   :  { %v704_v56 = vmul.f32 %v1322_v53, %v599_v40  ;;  %v179_v40 = vadd.f32 %v1505_v1, %v1449_v16 }
 0xc58   :  { %v707_v54 = vpop.permute.xlu1 %706 }
 0xc59   :  { %v709_v55 = vmul.f32 %v1322_v53, %v707_v54 }
 0xc5b   :  { %711 = vrot.lane.b32.xlu0 %v709_v55, %s1353_s2 }
 0xccd   :  { %v712_v57 = vpop.permute.xlu0 %711 }
 0xcce   :  { %v714_v58 = vadd.f32 %v712_v57, %v704_v56 }
 0xcd0   :  { %1323 = vtanh.f32 %v714_v58 }
 0xcda   :  { %v1324_v60 = vpop.eup %1323 }
 0xcdb   :  { %717 = vrot.lane.b32.xlu1 %v1324_v60, %s1352_s14 }
 0xd4d   :  { %v718_v61 = vpop.permute.xlu1 %717 }
 0xd4e   :  { %v720_v63 = vmul.f32 %v1322_v53, %v718_v61 }
 0xd50   :  { %724 = vrot.lane.b32.xlu0 %v720_v63, %s1353_s2 }
 0xdc2   :  { %v1551_v3 = vpop.permute.xlu0 %724 }
 0xdc3   :  { %1207 = vmatmul.mubr.msk.f32.vlgmr.msra.gmra.mrb[6].mxu1 %vm28_vm2, %v1551_v3 }
 0xdc4   :  { %1275 = vmatpush3.bf16.msra.mxu1 %v1400_v4  ;;  %1228 = vmatprep.mubr.msk.f32.mxu1 %vm1350_vm3, %v1351_v8 }
 0xdc5   :  { %1276 = vmatprep.subr.bf16.mxu1 %v1349_v0 }
 0xdc8   :  { %1278 = vmatpush3.bf16.msra.mxu1 %v1424_v11 }
 0xe96   :  { %v794_v6 = vpop.f32.mrb[6].mxu1 }
 0xe97   :  { %v798_v7 = vadd.f32 %v794_v6, %v169_v5  ;;  %v1208_v9 = vpop.f32.mrb[7].mxu1 }
 0xe99   :  { %1325 = vtanh.f32 %v798_v7  ;;  %v1074_v12 = vmul.f32 -1.442695, %v798_v7 }
 0xe9b   :  { %1327 = vpow2.f32 %v1074_v12 }
 0xea3   :  { %v1326_v10 = vpop.eup %1325 }
 0xea4   :  { %808 = vrot.lane.b32.xlu1 %v1326_v10, %s1352_s14 }
 0xea5   :  { %v1328_v4 = vpop.eup %1327 }
 0xea6   :  { %v802_v13 = vadd.f32 1.0, %v1328_v4 }
 0xea8   :  { %1329 = vrcp.f32 %v802_v13 }
 0xeb2   :  { %v1330_v8 = vpop.eup %1329 }
 0xeb3   :  { %v806_v11 = vmul.f32 %v1330_v8, %v714_v58 }
 0xf16   :  { %v809_v14 = vpop.permute.xlu1 %808 }
 0xf17   :  { %v811_v0 = vmul.f32 %v1330_v8, %v809_v14 }
 0xf19   :  { %813 = vrot.lane.b32.xlu0 %v811_v0, %s1353_s2 }
 0xf8b   :  { %v814_v15 = vpop.permute.xlu0 %813 }
 0xf8c   :  { %v816_v62 = vadd.f32 %v814_v15, %v806_v11 }
 0xf8e   :  { %1331 = vtanh.f32 %v816_v62 }
 0xf98   :  { %v1332_v17 = vpop.eup %1331 }
 0xf99   :  { %819 = vrot.lane.b32.xlu1 %v1332_v17, %s1352_s14 }
0x100b   :  { %v820_v18 = vpop.permute.xlu1 %819 }
0x100c   :  { %v1565_v19 = vmul.f32 %v1330_v8, %v820_v18 }
0x100e   :  { %826 = vrot.lane.b32.xlu0 %v1565_v19, %s1353_s2 }
0x1080   :  { %v827_v20 = vpop.permute.xlu0 %826 }
0x1081   :  { %1218 = vmatmul.mubr.msk.f32.vlgmr.msra.gmra.mrb[12].mxu0 %vm28_vm2, %v827_v20 }
0x1154   :  { %v896_v22 = vpop.f32.mrb[12].mxu0 }
0x1155   :  { %v900_v23 = vadd.f32 %v896_v22, %v174_v21  ;;  %v1219_v25 = vpop.f32.mrb[13].mxu0 }
0x1157   :  { %1333 = vtanh.f32 %v900_v23  ;;  %v1076_v27 = vmul.f32 -1.442695, %v900_v23 }
0x1159   :  { %1335 = vpow2.f32 %v1076_v27 }
0x1161   :  { %v1334_v26 = vpop.eup %1333 }
0x1162   :  { %910 = vrot.lane.b32.xlu1 %v1334_v26, %s1352_s14 }
0x1163   :  { %v1336_v28 = vpop.eup %1335 }
0x1164   :  { %v904_v29 = vadd.f32 1.0, %v1336_v28 }
0x1166   :  { %1337 = vrcp.f32 %v904_v29 }
0x1170   :  { %v1338_v30 = vpop.eup %1337 }
0x1171   :  { %v908_v33 = vmul.f32 %v1338_v30, %v816_v62 }
0x11d4   :  { %v911_v31 = vpop.permute.xlu1 %910 }
0x11d5   :  { %v913_v32 = vmul.f32 %v1338_v30, %v911_v31 }
0x11d7   :  { %915 = vrot.lane.b32.xlu0 %v913_v32, %s1353_s2 }
0x1249   :  { %v916_v34 = vpop.permute.xlu0 %915 }
0x124a   :  { %v918_v2 = vadd.f32 %v916_v34, %v908_v33 }
0x124c   :  { %1339 = vtanh.f32 %v918_v2 }
0x1256   :  { %v1340_v35 = vpop.eup %1339 }
0x1257   :  { %921 = vrot.lane.b32.xlu1 %v1340_v35, %s1352_s14 }
0x12c9   :  { %v922_v37 = vpop.permute.xlu1 %921 }
0x12ca   :  { %v924_v38 = vmul.f32 %v1338_v30, %v922_v37 }
0x12cc   :  { %928 = vrot.lane.b32.xlu0 %v924_v38, %s1353_s2 }
0x133e   :  { %v929_v39 = vpop.permute.xlu0 %928 }
0x133f   :  { %1229 = vmatmul.mubr.msk.f32.vlgmr.msra.gmra.mrb[8].mxu1 %vm28_vm2, %v929_v39 }
0x1412   :  { %v998_v41 = vpop.f32.mrb[8].mxu1 }
0x1413   :  { %v1002_v42 = vadd.f32 %v998_v41, %v179_v40  ;;  %v1230_v44 = vpop.f32.mrb[9].mxu1 }
0x1415   :  { %1341 = vtanh.f32 %v1002_v42  ;;  %v1078_v46 = vmul.f32 -1.442695, %v1002_v42 }
0x1417   :  { %1343 = vpow2.f32 %v1078_v46 }
0x141f   :  { %v1342_v45 = vpop.eup %1341 }
0x1420   :  { %1012 = vrot.lane.b32.xlu1 %v1342_v45, %s1352_s14 }
0x1421   :  { %v1344_v47 = vpop.eup %1343 }
0x1422   :  { %v1006_v48 = vadd.f32 1.0, %v1344_v47 }
0x1424   :  { %1345 = vrcp.f32 %v1006_v48 }
0x142e   :  { %v1346_v49 = vpop.eup %1345 }
0x142f   :  { %v1010_v16 = vmul.f32 %v1346_v49, %v918_v2 }
0x1492   :  { %v1013_v50 = vpop.permute.xlu1 %1012 }
0x1493   :  { %v1015_v51 = vmul.f32 %v1346_v49, %v1013_v50 }
0x1495   :  { %1017 = vrot.lane.b32.xlu0 %v1015_v51, %s1353_s2 }
0x1499   :  { %607 = vrot.lane.b32.xlu0 %v1497_v59, %s1352_s14 }
0x149d   :  { %610 = vrot.lane.b32.xlu0 %v1520_v24, %s1354_s0 }
0x1507   :  { %v1018_v1 = vpop.permute.xlu0 %1017 }
0x1508   :  { %v1020_v52 = vadd.f32 %v1018_v1, %v1010_v16 }
0x150a   :  { %1347 = vtanh.f32 %v1020_v52 }
0x150b   :  { %v608_v53 = vpop.permute.xlu0 %607 }
0x150c   :  { %v613_v54 = vsel %vm28_vm2, %v1457_v36, %v608_v53 }
0x150f   :  { %v611_v55 = vpop.permute.xlu0 %610 }
0x1510   :  { %v615_v56 = vsel %vm614_vm4, %v613_v54, %v611_v55 }
0x1511   :  { %v617_v57 = vsel %vm616_vm5, %v615_v56, %v1535_v43 }
0x1512   :  { %618 = vst [vmem:[%s1611_s6] sm:$0xff] %v617_v57 }
0x1514   :  { %v1348_v59 = vpop.eup %1347 }
0x1515   :  { %1023 = vrot.lane.b32.xlu1 %v1348_v59, %s1352_s14 }
0x1519   :  { %1028 = vrot.lane.b32.xlu1 %v1565_v19, %s1352_s14 }
0x151d   :  { %1031 = vrot.lane.b32.xlu1 %v924_v38, %s1354_s0 }
0x1521   :  { %1045 = vrot.lane.b32.xlu1 %v1020_v52, %s1354_s0 }
0x1587   :  { %v1024_v24 = vpop.permute.xlu1 %1023 }
0x1588   :  { %v1026_v36 = vmul.f32 %v1346_v49, %v1024_v24 }
0x158a   :  { %1040 = vrot.lane.b32.xlu0 %v1026_v36, %s1353_s2 }
0x158b   :  { %v1029_v58 = vpop.permute.xlu1 %1028 }
0x158c   :  { %v1034_v43 = vsel %vm28_vm2, %v1551_v3, %v1029_v58 }
0x158f   :  { %v1032_v60 = vpop.permute.xlu1 %1031 }
0x1590   :  { %v1035_v61 = vsel %vm614_vm4, %v1034_v43, %v1032_v60 }
0x1591   :  { %v1036_v63 = vsel %vm616_vm5, %v1035_v61, %v1026_v36 }
0x1592   :  { %1079 = vst [vmem:[%s1611_s6 + $0x8] sm:$0xff] %v1036_v63 }
0x1593   :  { %v1046_v5 = vpop.permute.xlu1 %1045 }
0x1594   :  { %1048 = vst.msk [vmem:[#allocation4] sm:$0xff] %vm28_vm2, %v1046_v5 }
0x15fc   :  { %v1041_v6 = vpop.permute.xlu0 %1040 }
0x15fd   :  { %1043 = vst.msk [vmem:[#allocation3] sm:$0xff] %vm28_vm2, %v1041_v6 }

</bundles_post_ra>
